<compile_context>
chip_gen: v7x
topology: tpu7x:2x2x1
jax: 0.10.0
libtpu: 0.0.40
codegen_flags: <defaults>
</compile_context>

<pallas_src>
import math

import jax
import jax.numpy as jnp
from jax.experimental import pallas as pl
from jax.experimental.pallas import tpu as pltpu

# ---------------------------------------------------------------------------
# model hyper-parameters (small, consistent with a TransformerEncoder forward)
# ---------------------------------------------------------------------------
B = 2      # batch
S = 8      # sequence length
BS = B * S
D = 32     # d_model
H = 4      # attention heads
DH = D // H
F = 64     # FFN hidden dim
C = 8      # task-head output classes

_EPS = 1e-5

# ---- packed (40, 128) f32 constant slab: biases / LN params / mask / pool --------
(ROW_BQKV, ROW_BO, ROW_LN1G, ROW_LN1B, ROW_LN2G, ROW_LN2B,
 ROW_B1, ROW_B2, ROW_BH) = range(9)
ROW_MASK0 = 16            # 16 rows x 16 cols : block-diagonal attention mask
ROW_POOL0 = 32            # 8  rows x 16 cols : block-average pooling matrix (rows>=B zero)
VEC_ROWS = 40
VEC_LANES = 128

# ---- packed (192, 128) bf16 weight slab --------------------------------------------
W_QKV_R0 = 0              # 32 rows x 96 cols  (fused Q|K|V)
W_O_R0 = 32               # 32 rows x 32 cols
W_1_R0 = 64               # 32 rows x 64 cols
W_2_R0 = 96               # 64 rows x 32 cols
W_H_R0 = 160              # 32 rows x  8 cols (rest of the 128 lanes zero -> padded head)
W_ROWS = 192


def _layernorm(x, gamma, beta):
    mu = jnp.mean(x, axis=-1, keepdims=True)
    xc = x - mu
    var = jnp.mean(xc * xc, axis=-1, keepdims=True)
    inv = jax.lax.rsqrt(var + _EPS)
    return xc * inv * gamma + beta


def _gelu(x):
    # TODO(synk): PyTorch nn.GELU defaults to exact erf (and TransformerEncoderLayer's
    # default activation is actually ReLU); tanh approximation used here.
    c = math.sqrt(2.0 / math.pi)
    return 0.5 * x * (1.0 + jnp.tanh(c * (x + 0.044715 * x * x * x)))


def tuning_kernel(
    x_ref,       # (B*S, D)    f32 activations, batch folded into sublane axis
    wslab_ref,   # (192, 128)  bf16 packed weights
    vec_ref,     # (40, 128)   f32 packed biases / LN params / mask / pool matrix
    out_ref,     # (8, 128)    f32 padded logits (full unmasked store)
):
    x = x_ref[...]                                   # (16, 32) f32
    vecs = vec_ref[...]                              # read whole slab once
    wslab = wslab_ref[...]                           # bf16

    bqkv = vecs[ROW_BQKV:ROW_BQKV + 1, 0:3 * D]      # (1, 96)
    bo = vecs[ROW_BO:ROW_BO + 1, 0:D]
    ln1_g = vecs[ROW_LN1G:ROW_LN1G + 1, 0:D]
    ln1_b = vecs[ROW_LN1B:ROW_LN1B + 1, 0:D]
    ln2_g = vecs[ROW_LN2G:ROW_LN2G + 1, 0:D]
    ln2_b = vecs[ROW_LN2B:ROW_LN2B + 1, 0:D]
    b1 = vecs[ROW_B1:ROW_B1 + 1, 0:F]
    b2 = vecs[ROW_B2:ROW_B2 + 1, 0:D]
    bh_pad = vecs[ROW_BH:ROW_BH + 1, :]              # (1, 128), lanes >= C are zero
    amask = vecs[ROW_MASK0:ROW_MASK0 + BS, 0:BS]     # (16, 16) block-diagonal 0/-1e9
    pool = vecs[ROW_POOL0:ROW_POOL0 + 8, 0:BS]       # (8, 16), rows >= B are zero

    wqkv = wslab[W_QKV_R0:W_QKV_R0 + D, 0:3 * D]     # (32, 96)  bf16
    wo = wslab[W_O_R0:W_O_R0 + D, 0:D]               # (32, 32)  bf16
    w1 = wslab[W_1_R0:W_1_R0 + D, 0:F]               # (32, 64)  bf16
    w2 = wslab[W_2_R0:W_2_R0 + F, 0:D]               # (64, 32)  bf16
    wh_pad = wslab[W_H_R0:W_H_R0 + D, :]             # (32, 128) bf16, lanes >= C zero

    # ---- multi-head self-attention sublayer (post-LN) ----------------------
    x_bf = x.astype(jnp.bfloat16)
    qkv = jnp.dot(x_bf, wqkv, preferred_element_type=jnp.float32) + bqkv   # (16, 96) f32
    q_bf = qkv[:, 0:D].astype(jnp.bfloat16)
    kt_bf = qkv[:, D:2 * D].astype(jnp.bfloat16).T                         # one transpose
    v_bf = qkv[:, 2 * D:3 * D].astype(jnp.bfloat16)

    scale = 1.0 / math.sqrt(DH)
    acc = jnp.zeros((BS, D), jnp.float32)
    for h in range(H):                               # static loop over heads only
        c0 = h * DH
        s = jnp.dot(q_bf[:, c0:c0 + DH], kt_bf[c0:c0 + DH, :],
                    preferred_element_type=jnp.float32) * scale + amask    # (16, 16)
        s = s - jnp.max(s, axis=-1, keepdims=True)
        p = jnp.exp(s)
        p = p * pl.reciprocal(jnp.sum(p, axis=-1, keepdims=True), approx=True)
        oh = jnp.dot(p.astype(jnp.bfloat16), v_bf[:, c0:c0 + DH],
                     preferred_element_type=jnp.float32)                   # (16, 8)
        # fold Wo into each head -> no lane concat
        acc = acc + jnp.dot(oh.astype(jnp.bfloat16), wo[c0:c0 + DH, :],
                            preferred_element_type=jnp.float32)            # (16, 32)
    attn = acc + bo

    x1 = _layernorm(x + attn, ln1_g, ln1_b)          # post-LN + residual (f32)

    # ---- feed-forward sublayer (post-LN) ------------------------------------
    f = jnp.dot(x1.astype(jnp.bfloat16), w1, preferred_element_type=jnp.float32) + b1
    f = _gelu(f)
    f = jnp.dot(f.astype(jnp.bfloat16), w2, preferred_element_type=jnp.float32) + b2
    x2 = _layernorm(x1 + f, ln2_g, ln2_b)

    # ---- mean-pool via constant block-average matmul + padded task head -----
    pooled = jnp.dot(pool.astype(jnp.bfloat16), x2.astype(jnp.bfloat16),
                     preferred_element_type=jnp.float32)                   # (8, 32)
    logits = jnp.dot(pooled.astype(jnp.bfloat16), wh_pad,
                     preferred_element_type=jnp.float32) + bh_pad          # (8, 128)
    out_ref[...] = logits.astype(out_ref.dtype)      # single full unmasked store


def tuning_model_forward(x, wslab, vecs):
    """x: (B, S, D) float32 -> (B, C) float32."""
    x2 = x.reshape(BS, D)                            # fold batch into sublane axis
    flops = 2 * (BS * D * 3 * D                      # qkv projection
                 + H * (BS * BS * DH + BS * BS * DH + BS * DH * D)   # attention
                 + BS * D * F + BS * F * D           # FFN
                 + 8 * BS * D + 8 * D * 128)         # pool + head
    transcendentals = H * BS * BS + BS * F + 2 * BS + H * BS
    bytes_accessed = BS * D * 4 + W_ROWS * 128 * 2 + VEC_ROWS * 128 * 4 + 8 * 128 * 4
    out_pad = pl.pallas_call(
        tuning_kernel,
        out_shape=jax.ShapeDtypeStruct((8, 128), jnp.float32),
        # no grid: single invocation; every operand is a full-array VMEM block
        compiler_params=pltpu.CompilerParams(vmem_limit_bytes=4 * 1024 * 1024),
        cost_estimate=pl.CostEstimate(flops=flops,
                                      transcendentals=transcendentals,
                                      bytes_accessed=bytes_accessed),
    )(x2, wslab.astype(jnp.bfloat16), vecs)
    return out_pad[:B, :C]


def init_params(key):
    keys = jax.random.split(key, 10)

    def w(k, shape, fan_in):
        return jax.random.normal(k, shape, jnp.float32) / math.sqrt(fan_in)

    wq = w(keys[0], (D, D), D)
    wk = w(keys[1], (D, D), D)
    wv = w(keys[2], (D, D), D)
    wqkv = jnp.concatenate([wq, wk, wv], axis=1)     # (D, 3D)
    wo = w(keys[3], (D, D), D)
    w1 = w(keys[4], (D, F), D)
    w2 = w(keys[5], (F, D), F)
    wh = w(keys[6], (D, C), D)

    # --- packed weight slab (f32 here; cast to bf16 in the wrapper) ---------
    wslab = jnp.zeros((W_ROWS, 128), jnp.float32)
    wslab = wslab.at[W_QKV_R0:W_QKV_R0 + D, 0:3 * D].set(wqkv)
    wslab = wslab.at[W_O_R0:W_O_R0 + D, 0:D].set(wo)
    wslab = wslab.at[W_1_R0:W_1_R0 + D, 0:F].set(w1)
    wslab = wslab.at[W_2_R0:W_2_R0 + F, 0:D].set(w2)
    wslab = wslab.at[W_H_R0:W_H_R0 + D, 0:C].set(wh)

    # --- packed constant slab -------------------------------------------------
    vecs = jnp.zeros((VEC_ROWS, VEC_LANES), jnp.float32)
    vecs = vecs.at[ROW_BQKV, 0:3 * D].set(
        0.02 * jax.random.normal(keys[7], (3 * D,), jnp.float32))
    vecs = vecs.at[ROW_BO, 0:D].set(
        0.02 * jax.random.normal(keys[8], (D,), jnp.float32))
    vecs = vecs.at[ROW_B1, 0:F].set(
        0.02 * jax.random.normal(keys[9], (F,), jnp.float32))
    vecs = vecs.at[ROW_LN1G, 0:D].set(1.0)           # LN gammas = 1
    vecs = vecs.at[ROW_LN2G, 0:D].set(1.0)
    # LN betas, b2, bh stay zero
    grp = jnp.arange(BS) // S                        # block-diagonal attention mask
    amask = jnp.where(grp[:, None] == grp[None, :], 0.0, -1e9).astype(jnp.float32)
    vecs = vecs.at[ROW_MASK0:ROW_MASK0 + BS, 0:BS].set(amask)
    pool = jnp.zeros((8, BS), jnp.float32)           # padded block-average pooling matrix
    for b in range(B):
        pool = pool.at[b, b * S:(b + 1) * S].set(1.0 / S)
    vecs = vecs.at[ROW_POOL0:ROW_POOL0 + 8, 0:BS].set(pool)
    return wslab, vecs


def reference_forward(x, wslab, vecs):
    """Pure-JAX f32 reference (same math, unfused) for a numerical sanity check."""
    hp = jax.lax.Precision.HIGHEST
    wqkv = wslab[W_QKV_R0:W_QKV_R0 + D, 0:3 * D]
    wo = wslab[W_O_R0:W_O_R0 + D, 0:D]
    w1 = wslab[W_1_R0:W_1_R0 + D, 0:F]
    w2 = wslab[W_2_R0:W_2_R0 + F, 0:D]
    wh = wslab[W_H_R0:W_H_R0 + D, 0:C]
    bqkv = vecs[ROW_BQKV, 0:3 * D]
    bo = vecs[ROW_BO, 0:D]
    ln1_g, ln1_b = vecs[ROW_LN1G, 0:D], vecs[ROW_LN1B, 0:D]
    ln2_g, ln2_b = vecs[ROW_LN2G, 0:D], vecs[ROW_LN2B, 0:D]
    b1, b2, bh = vecs[ROW_B1, 0:F], vecs[ROW_B2, 0:D], vecs[ROW_BH, 0:C]

    def ln(t, g, b):
        mu = jnp.mean(t, -1, keepdims=True)
        tc = t - mu
        var = jnp.mean(tc * tc, -1, keepdims=True)
        return tc * jax.lax.rsqrt(var + _EPS) * g + b

    outs = []
    for bi in range(B):
        xb = x[bi]
        qkv = jnp.dot(xb, wqkv, precision=hp) + bqkv
        q, k, v = qkv[:, 0:D], qkv[:, D:2 * D], qkv[:, 2 * D:3 * D]
        heads = []
        for h in range(H):
            sl = slice(h * DH, (h + 1) * DH)
            s = jnp.dot(q[:, sl], k[:, sl].T, precision=hp) / math.sqrt(DH)
            p = jax.nn.softmax(s, axis=-1)
            heads.append(jnp.dot(p, v[:, sl], precision=hp))
        attn = jnp.dot(jnp.concatenate(heads, -1), wo, precision=hp) + bo
        xb = ln(xb + attn, ln1_g, ln1_b)
        f = _gelu(jnp.dot(xb, w1, precision=hp) + b1)
        f = jnp.dot(f, w2, precision=hp) + b2
        xb = ln(xb + f, ln2_g, ln2_b)
        pooled = jnp.mean(xb, axis=0)
        outs.append(jnp.dot(pooled, wh, precision=hp) + bh)
    return jnp.stack(outs, axis=0)


if __name__ == "__main__":
    key = jax.random.PRNGKey(0)
    k_x, k_p = jax.random.split(key)
    x = jax.random.normal(k_x, (B, S, D), jnp.float32)
    wslab, vecs = init_params(k_p)

    out = tuning_model_forward(x, wslab, vecs)
    out = jax.block_until_ready(out)
    assert out.shape == (B, C) and out.dtype == jnp.float32
    assert bool(jnp.all(jnp.isfinite(out)))

    ref = reference_forward(x, wslab, vecs)
    # tolerance accounts for bf16 MXU inputs + approx reciprocal vs. an f32-HIGHEST reference
    assert bool(jnp.allclose(out, ref, atol=1e-1, rtol=1e-1)), "kernel/reference mismatch"
    print("KERNEL_OK")
</pallas_src>

<mosaic_0001>
module attributes {stable_mosaic.version = 11 : i64} {
  func.func @tuning_kernel(%arg0: memref<16x32xf32, #tpu.memory_space<vmem>>, %arg1: memref<192x128xbf16, #tpu.memory_space<vmem>>, %arg2: memref<40x128xf32, #tpu.memory_space<vmem>>, %arg3: memref<8x128xf32, #tpu.memory_space<vmem>>) attributes {dimension_semantics = [], scalar_prefetch = 0 : i64, scratch_operands = 0 : i64, tpu.core_type = #tpu.core_type<tc>} {
    %c0 = arith.constant 0 : index
    %c0_0 = arith.constant 0 : index
    %0 = vector.load %arg0[%c0, %c0_0] : memref<16x32xf32, #tpu.memory_space<vmem>>, vector<16x32xf32>
    %c0_1 = arith.constant 0 : index
    %c0_2 = arith.constant 0 : index
    %1 = vector.load %arg2[%c0_1, %c0_2] : memref<40x128xf32, #tpu.memory_space<vmem>>, vector<40x128xf32>
    %c0_3 = arith.constant 0 : index
    %c0_4 = arith.constant 0 : index
    %2 = vector.load %arg1[%c0_3, %c0_4] : memref<192x128xbf16, #tpu.memory_space<vmem>>, vector<192x128xbf16>
    %3 = vector.extract_strided_slice %1 {offsets = [0, 0], sizes = [1, 96], strides = [1, 1]} : vector<40x128xf32> to vector<1x96xf32>
    %4 = vector.extract_strided_slice %1 {offsets = [1, 0], sizes = [1, 32], strides = [1, 1]} : vector<40x128xf32> to vector<1x32xf32>
    %5 = vector.extract_strided_slice %1 {offsets = [2, 0], sizes = [1, 32], strides = [1, 1]} : vector<40x128xf32> to vector<1x32xf32>
    %6 = vector.extract_strided_slice %1 {offsets = [3, 0], sizes = [1, 32], strides = [1, 1]} : vector<40x128xf32> to vector<1x32xf32>
    %7 = vector.extract_strided_slice %1 {offsets = [4, 0], sizes = [1, 32], strides = [1, 1]} : vector<40x128xf32> to vector<1x32xf32>
    %8 = vector.extract_strided_slice %1 {offsets = [5, 0], sizes = [1, 32], strides = [1, 1]} : vector<40x128xf32> to vector<1x32xf32>
    %9 = vector.extract_strided_slice %1 {offsets = [6, 0], sizes = [1, 64], strides = [1, 1]} : vector<40x128xf32> to vector<1x64xf32>
    %10 = vector.extract_strided_slice %1 {offsets = [7, 0], sizes = [1, 32], strides = [1, 1]} : vector<40x128xf32> to vector<1x32xf32>
    %11 = vector.extract_strided_slice %1 {offsets = [8, 0], sizes = [1, 128], strides = [1, 1]} : vector<40x128xf32> to vector<1x128xf32>
    %12 = vector.extract_strided_slice %1 {offsets = [16, 0], sizes = [16, 16], strides = [1, 1]} : vector<40x128xf32> to vector<16x16xf32>
    %13 = vector.extract_strided_slice %1 {offsets = [32, 0], sizes = [8, 16], strides = [1, 1]} : vector<40x128xf32> to vector<8x16xf32>
    %14 = vector.extract_strided_slice %2 {offsets = [0, 0], sizes = [32, 96], strides = [1, 1]} : vector<192x128xbf16> to vector<32x96xbf16>
    %15 = vector.extract_strided_slice %2 {offsets = [32, 0], sizes = [32, 32], strides = [1, 1]} : vector<192x128xbf16> to vector<32x32xbf16>
    %16 = vector.extract_strided_slice %2 {offsets = [64, 0], sizes = [32, 64], strides = [1, 1]} : vector<192x128xbf16> to vector<32x64xbf16>
    %17 = vector.extract_strided_slice %2 {offsets = [96, 0], sizes = [64, 32], strides = [1, 1]} : vector<192x128xbf16> to vector<64x32xbf16>
    %18 = vector.extract_strided_slice %2 {offsets = [160, 0], sizes = [32, 128], strides = [1, 1]} : vector<192x128xbf16> to vector<32x128xbf16>
    %19 = arith.truncf %0 : vector<16x32xf32> to vector<16x32xbf16>
    %cst = arith.constant dense<0.000000e+00> : vector<16x96xf32>
    %20 = tpu.matmul %19, %14, %cst {dimension_numbers = #tpu.dot_dimension_numbers<[1], [0], [0], [1], [0, 0, 1, 1], [], []>} : vector<16x32xbf16>, vector<32x96xbf16>, vector<16x96xf32> -> vector<16x96xf32>
    %21 = vector.broadcast %3 : vector<1x96xf32> to vector<16x96xf32>
    %22 = arith.addf %20, %21 : vector<16x96xf32>
    %23 = vector.extract_strided_slice %22 {offsets = [0, 0], sizes = [16, 32], strides = [1, 1]} : vector<16x96xf32> to vector<16x32xf32>
    %24 = arith.truncf %23 : vector<16x32xf32> to vector<16x32xbf16>
    %25 = vector.extract_strided_slice %22 {offsets = [0, 32], sizes = [16, 32], strides = [1, 1]} : vector<16x96xf32> to vector<16x32xf32>
    %26 = arith.truncf %25 : vector<16x32xf32> to vector<16x32xbf16>
    %27 = tpu.transpose %26, [1, 0] : vector<16x32xbf16> -> vector<32x16xbf16>
    %28 = vector.extract_strided_slice %22 {offsets = [0, 64], sizes = [16, 32], strides = [1, 1]} : vector<16x96xf32> to vector<16x32xf32>
    %29 = arith.truncf %28 : vector<16x32xf32> to vector<16x32xbf16>
    %cst_5 = arith.constant 0.000000e+00 : f32
    %30 = vector.broadcast %cst_5 : f32 to vector<16x32xf32>
    %31 = vector.extract_strided_slice %24 {offsets = [0, 0], sizes = [16, 8], strides = [1, 1]} : vector<16x32xbf16> to vector<16x8xbf16>
    %32 = vector.extract_strided_slice %27 {offsets = [0, 0], sizes = [8, 16], strides = [1, 1]} : vector<32x16xbf16> to vector<8x16xbf16>
    %cst_6 = arith.constant dense<0.000000e+00> : vector<16x16xf32>
    %33 = tpu.matmul %31, %32, %cst_6 {dimension_numbers = #tpu.dot_dimension_numbers<[1], [0], [0], [1], [0, 0, 1, 1], [], []>} : vector<16x8xbf16>, vector<8x16xbf16>, vector<16x16xf32> -> vector<16x16xf32>
    %cst_7 = arith.constant 0.353553385 : f32
    %34 = vector.broadcast %cst_7 : f32 to vector<16x16xf32>
    %35 = arith.mulf %33, %34 : vector<16x16xf32>
    %36 = arith.addf %35, %12 : vector<16x16xf32>
    %cst_8 = arith.constant dense<0xFF800000> : vector<16xf32>
    %37 = vector.multi_reduction <maximumf>, %36, %cst_8 [1] : vector<16x16xf32> to vector<16xf32>
    %38 = vector.shape_cast %37 : vector<16xf32> to vector<16x1xf32>
    %39 = vector.broadcast %38 : vector<16x1xf32> to vector<16x16xf32>
    %40 = arith.subf %36, %39 : vector<16x16xf32>
    %41 = math.exp %40 : vector<16x16xf32>
    %cst_9 = arith.constant dense<0.000000e+00> : vector<16xf32>
    %42 = vector.multi_reduction <add>, %41, %cst_9 [1] : vector<16x16xf32> to vector<16xf32>
    %43 = vector.shape_cast %42 : vector<16xf32> to vector<16x1xf32>
    %44 = tpu.reciprocal %43 {approx = true} : vector<16x1xf32> -> vector<16x1xf32>
    %45 = vector.broadcast %44 : vector<16x1xf32> to vector<16x16xf32>
    %46 = arith.mulf %41, %45 : vector<16x16xf32>
    %47 = arith.truncf %46 : vector<16x16xf32> to vector<16x16xbf16>
    %48 = vector.extract_strided_slice %29 {offsets = [0, 0], sizes = [16, 8], strides = [1, 1]} : vector<16x32xbf16> to vector<16x8xbf16>
    %cst_10 = arith.constant dense<0.000000e+00> : vector<16x8xf32>
    %49 = tpu.matmul %47, %48, %cst_10 {dimension_numbers = #tpu.dot_dimension_numbers<[1], [0], [0], [1], [0, 0, 1, 1], [], []>} : vector<16x16xbf16>, vector<16x8xbf16>, vector<16x8xf32> -> vector<16x8xf32>
    %50 = arith.truncf %49 : vector<16x8xf32> to vector<16x8xbf16>
    %51 = vector.extract_strided_slice %15 {offsets = [0, 0], sizes = [8, 32], strides = [1, 1]} : vector<32x32xbf16> to vector<8x32xbf16>
    %cst_11 = arith.constant dense<0.000000e+00> : vector<16x32xf32>
    %52 = tpu.matmul %50, %51, %cst_11 {dimension_numbers = #tpu.dot_dimension_numbers<[1], [0], [0], [1], [0, 0, 1, 1], [], []>} : vector<16x8xbf16>, vector<8x32xbf16>, vector<16x32xf32> -> vector<16x32xf32>
    %53 = arith.addf %30, %52 : vector<16x32xf32>
    %54 = vector.extract_strided_slice %24 {offsets = [0, 8], sizes = [16, 8], strides = [1, 1]} : vector<16x32xbf16> to vector<16x8xbf16>
    %55 = vector.extract_strided_slice %27 {offsets = [8, 0], sizes = [8, 16], strides = [1, 1]} : vector<32x16xbf16> to vector<8x16xbf16>
    %cst_12 = arith.constant dense<0.000000e+00> : vector<16x16xf32>
    %56 = tpu.matmul %54, %55, %cst_12 {dimension_numbers = #tpu.dot_dimension_numbers<[1], [0], [0], [1], [0, 0, 1, 1], [], []>} : vector<16x8xbf16>, vector<8x16xbf16>, vector<16x16xf32> -> vector<16x16xf32>
    %cst_13 = arith.constant 0.353553385 : f32
    %57 = vector.broadcast %cst_13 : f32 to vector<16x16xf32>
    %58 = arith.mulf %56, %57 : vector<16x16xf32>
    %59 = arith.addf %58, %12 : vector<16x16xf32>
    %cst_14 = arith.constant dense<0xFF800000> : vector<16xf32>
    %60 = vector.multi_reduction <maximumf>, %59, %cst_14 [1] : vector<16x16xf32> to vector<16xf32>
    %61 = vector.shape_cast %60 : vector<16xf32> to vector<16x1xf32>
    %62 = vector.broadcast %61 : vector<16x1xf32> to vector<16x16xf32>
    %63 = arith.subf %59, %62 : vector<16x16xf32>
    %64 = math.exp %63 : vector<16x16xf32>
    %cst_15 = arith.constant dense<0.000000e+00> : vector<16xf32>
    %65 = vector.multi_reduction <add>, %64, %cst_15 [1] : vector<16x16xf32> to vector<16xf32>
    %66 = vector.shape_cast %65 : vector<16xf32> to vector<16x1xf32>
    %67 = tpu.reciprocal %66 {approx = true} : vector<16x1xf32> -> vector<16x1xf32>
    %68 = vector.broadcast %67 : vector<16x1xf32> to vector<16x16xf32>
    %69 = arith.mulf %64, %68 : vector<16x16xf32>
    %70 = arith.truncf %69 : vector<16x16xf32> to vector<16x16xbf16>
    %71 = vector.extract_strided_slice %29 {offsets = [0, 8], sizes = [16, 8], strides = [1, 1]} : vector<16x32xbf16> to vector<16x8xbf16>
    %cst_16 = arith.constant dense<0.000000e+00> : vector<16x8xf32>
    %72 = tpu.matmul %70, %71, %cst_16 {dimension_numbers = #tpu.dot_dimension_numbers<[1], [0], [0], [1], [0, 0, 1, 1], [], []>} : vector<16x16xbf16>, vector<16x8xbf16>, vector<16x8xf32> -> vector<16x8xf32>
    %73 = arith.truncf %72 : vector<16x8xf32> to vector<16x8xbf16>
    %74 = vector.extract_strided_slice %15 {offsets = [8, 0], sizes = [8, 32], strides = [1, 1]} : vector<32x32xbf16> to vector<8x32xbf16>
    %cst_17 = arith.constant dense<0.000000e+00> : vector<16x32xf32>
    %75 = tpu.matmul %73, %74, %cst_17 {dimension_numbers = #tpu.dot_dimension_numbers<[1], [0], [0], [1], [0, 0, 1, 1], [], []>} : vector<16x8xbf16>, vector<8x32xbf16>, vector<16x32xf32> -> vector<16x32xf32>
    %76 = arith.addf %53, %75 : vector<16x32xf32>
    %77 = vector.extract_strided_slice %24 {offsets = [0, 16], sizes = [16, 8], strides = [1, 1]} : vector<16x32xbf16> to vector<16x8xbf16>
    %78 = vector.extract_strided_slice %27 {offsets = [16, 0], sizes = [8, 16], strides = [1, 1]} : vector<32x16xbf16> to vector<8x16xbf16>
    %cst_18 = arith.constant dense<0.000000e+00> : vector<16x16xf32>
    %79 = tpu.matmul %77, %78, %cst_18 {dimension_numbers = #tpu.dot_dimension_numbers<[1], [0], [0], [1], [0, 0, 1, 1], [], []>} : vector<16x8xbf16>, vector<8x16xbf16>, vector<16x16xf32> -> vector<16x16xf32>
    %cst_19 = arith.constant 0.353553385 : f32
    %80 = vector.broadcast %cst_19 : f32 to vector<16x16xf32>
    %81 = arith.mulf %79, %80 : vector<16x16xf32>
    %82 = arith.addf %81, %12 : vector<16x16xf32>
    %cst_20 = arith.constant dense<0xFF800000> : vector<16xf32>
    %83 = vector.multi_reduction <maximumf>, %82, %cst_20 [1] : vector<16x16xf32> to vector<16xf32>
    %84 = vector.shape_cast %83 : vector<16xf32> to vector<16x1xf32>
    %85 = vector.broadcast %84 : vector<16x1xf32> to vector<16x16xf32>
    %86 = arith.subf %82, %85 : vector<16x16xf32>
    %87 = math.exp %86 : vector<16x16xf32>
    %cst_21 = arith.constant dense<0.000000e+00> : vector<16xf32>
    %88 = vector.multi_reduction <add>, %87, %cst_21 [1] : vector<16x16xf32> to vector<16xf32>
    %89 = vector.shape_cast %88 : vector<16xf32> to vector<16x1xf32>
    %90 = tpu.reciprocal %89 {approx = true} : vector<16x1xf32> -> vector<16x1xf32>
    %91 = vector.broadcast %90 : vector<16x1xf32> to vector<16x16xf32>
    %92 = arith.mulf %87, %91 : vector<16x16xf32>
    %93 = arith.truncf %92 : vector<16x16xf32> to vector<16x16xbf16>
    %94 = vector.extract_strided_slice %29 {offsets = [0, 16], sizes = [16, 8], strides = [1, 1]} : vector<16x32xbf16> to vector<16x8xbf16>
    %cst_22 = arith.constant dense<0.000000e+00> : vector<16x8xf32>
    %95 = tpu.matmul %93, %94, %cst_22 {dimension_numbers = #tpu.dot_dimension_numbers<[1], [0], [0], [1], [0, 0, 1, 1], [], []>} : vector<16x16xbf16>, vector<16x8xbf16>, vector<16x8xf32> -> vector<16x8xf32>
    %96 = arith.truncf %95 : vector<16x8xf32> to vector<16x8xbf16>
    %97 = vector.extract_strided_slice %15 {offsets = [16, 0], sizes = [8, 32], strides = [1, 1]} : vector<32x32xbf16> to vector<8x32xbf16>
    %cst_23 = arith.constant dense<0.000000e+00> : vector<16x32xf32>
    %98 = tpu.matmul %96, %97, %cst_23 {dimension_numbers = #tpu.dot_dimension_numbers<[1], [0], [0], [1], [0, 0, 1, 1], [], []>} : vector<16x8xbf16>, vector<8x32xbf16>, vector<16x32xf32> -> vector<16x32xf32>
    %99 = arith.addf %76, %98 : vector<16x32xf32>
    %100 = vector.extract_strided_slice %24 {offsets = [0, 24], sizes = [16, 8], strides = [1, 1]} : vector<16x32xbf16> to vector<16x8xbf16>
    %101 = vector.extract_strided_slice %27 {offsets = [24, 0], sizes = [8, 16], strides = [1, 1]} : vector<32x16xbf16> to vector<8x16xbf16>
    %cst_24 = arith.constant dense<0.000000e+00> : vector<16x16xf32>
    %102 = tpu.matmul %100, %101, %cst_24 {dimension_numbers = #tpu.dot_dimension_numbers<[1], [0], [0], [1], [0, 0, 1, 1], [], []>} : vector<16x8xbf16>, vector<8x16xbf16>, vector<16x16xf32> -> vector<16x16xf32>
    %cst_25 = arith.constant 0.353553385 : f32
    %103 = vector.broadcast %cst_25 : f32 to vector<16x16xf32>
    %104 = arith.mulf %102, %103 : vector<16x16xf32>
    %105 = arith.addf %104, %12 : vector<16x16xf32>
    %cst_26 = arith.constant dense<0xFF800000> : vector<16xf32>
    %106 = vector.multi_reduction <maximumf>, %105, %cst_26 [1] : vector<16x16xf32> to vector<16xf32>
    %107 = vector.shape_cast %106 : vector<16xf32> to vector<16x1xf32>
    %108 = vector.broadcast %107 : vector<16x1xf32> to vector<16x16xf32>
    %109 = arith.subf %105, %108 : vector<16x16xf32>
    %110 = math.exp %109 : vector<16x16xf32>
    %cst_27 = arith.constant dense<0.000000e+00> : vector<16xf32>
    %111 = vector.multi_reduction <add>, %110, %cst_27 [1] : vector<16x16xf32> to vector<16xf32>
    %112 = vector.shape_cast %111 : vector<16xf32> to vector<16x1xf32>
    %113 = tpu.reciprocal %112 {approx = true} : vector<16x1xf32> -> vector<16x1xf32>
    %114 = vector.broadcast %113 : vector<16x1xf32> to vector<16x16xf32>
    %115 = arith.mulf %110, %114 : vector<16x16xf32>
    %116 = arith.truncf %115 : vector<16x16xf32> to vector<16x16xbf16>
    %117 = vector.extract_strided_slice %29 {offsets = [0, 24], sizes = [16, 8], strides = [1, 1]} : vector<16x32xbf16> to vector<16x8xbf16>
    %cst_28 = arith.constant dense<0.000000e+00> : vector<16x8xf32>
    %118 = tpu.matmul %116, %117, %cst_28 {dimension_numbers = #tpu.dot_dimension_numbers<[1], [0], [0], [1], [0, 0, 1, 1], [], []>} : vector<16x16xbf16>, vector<16x8xbf16>, vector<16x8xf32> -> vector<16x8xf32>
    %119 = arith.truncf %118 : vector<16x8xf32> to vector<16x8xbf16>
    %120 = vector.extract_strided_slice %15 {offsets = [24, 0], sizes = [8, 32], strides = [1, 1]} : vector<32x32xbf16> to vector<8x32xbf16>
    %cst_29 = arith.constant dense<0.000000e+00> : vector<16x32xf32>
    %121 = tpu.matmul %119, %120, %cst_29 {dimension_numbers = #tpu.dot_dimension_numbers<[1], [0], [0], [1], [0, 0, 1, 1], [], []>} : vector<16x8xbf16>, vector<8x32xbf16>, vector<16x32xf32> -> vector<16x32xf32>
    %122 = arith.addf %99, %121 : vector<16x32xf32>
    %123 = vector.broadcast %4 : vector<1x32xf32> to vector<16x32xf32>
    %124 = arith.addf %122, %123 : vector<16x32xf32>
    %125 = arith.addf %0, %124 : vector<16x32xf32>
    %cst_30 = arith.constant dense<0.000000e+00> : vector<16xf32>
    %126 = vector.multi_reduction <add>, %125, %cst_30 [1] : vector<16x32xf32> to vector<16xf32>
    %127 = vector.shape_cast %126 : vector<16xf32> to vector<16x1xf32>
    %cst_31 = arith.constant 3.200000e+01 : f32
    %128 = vector.broadcast %cst_31 : f32 to vector<16x1xf32>
    %129 = arith.divf %127, %128 : vector<16x1xf32>
    %130 = vector.broadcast %129 : vector<16x1xf32> to vector<16x32xf32>
    %131 = arith.subf %125, %130 : vector<16x32xf32>
    %132 = arith.mulf %131, %131 : vector<16x32xf32>
    %cst_32 = arith.constant dense<0.000000e+00> : vector<16xf32>
    %133 = vector.multi_reduction <add>, %132, %cst_32 [1] : vector<16x32xf32> to vector<16xf32>
    %134 = vector.shape_cast %133 : vector<16xf32> to vector<16x1xf32>
    %cst_33 = arith.constant 3.200000e+01 : f32
    %135 = vector.broadcast %cst_33 : f32 to vector<16x1xf32>
    %136 = arith.divf %134, %135 : vector<16x1xf32>
    %cst_34 = arith.constant 9.99999974E-6 : f32
    %137 = vector.broadcast %cst_34 : f32 to vector<16x1xf32>
    %138 = arith.addf %136, %137 : vector<16x1xf32>
    %139 = math.rsqrt %138 : vector<16x1xf32>
    %140 = vector.broadcast %139 : vector<16x1xf32> to vector<16x32xf32>
    %141 = arith.mulf %131, %140 : vector<16x32xf32>
    %142 = vector.broadcast %5 : vector<1x32xf32> to vector<16x32xf32>
    %143 = arith.mulf %141, %142 : vector<16x32xf32>
    %144 = vector.broadcast %6 : vector<1x32xf32> to vector<16x32xf32>
    %145 = arith.addf %143, %144 : vector<16x32xf32>
    %146 = arith.truncf %145 : vector<16x32xf32> to vector<16x32xbf16>
    %cst_35 = arith.constant dense<0.000000e+00> : vector<16x64xf32>
    %147 = tpu.matmul %146, %16, %cst_35 {dimension_numbers = #tpu.dot_dimension_numbers<[1], [0], [0], [1], [0, 0, 1, 1], [], []>} : vector<16x32xbf16>, vector<32x64xbf16>, vector<16x64xf32> -> vector<16x64xf32>
    %148 = vector.broadcast %9 : vector<1x64xf32> to vector<16x64xf32>
    %149 = arith.addf %147, %148 : vector<16x64xf32>
    %cst_36 = arith.constant 5.000000e-01 : f32
    %150 = vector.broadcast %cst_36 : f32 to vector<16x64xf32>
    %151 = arith.mulf %150, %149 : vector<16x64xf32>
    %cst_37 = arith.constant 4.471500e-02 : f32
    %152 = vector.broadcast %cst_37 : f32 to vector<16x64xf32>
    %153 = arith.mulf %152, %149 : vector<16x64xf32>
    %154 = arith.mulf %153, %149 : vector<16x64xf32>
    %155 = arith.mulf %154, %149 : vector<16x64xf32>
    %156 = arith.addf %149, %155 : vector<16x64xf32>
    %cst_38 = arith.constant 0.797884583 : f32
    %157 = vector.broadcast %cst_38 : f32 to vector<16x64xf32>
    %158 = arith.mulf %157, %156 : vector<16x64xf32>
    %159 = math.tanh %158 : vector<16x64xf32>
    %cst_39 = arith.constant 1.000000e+00 : f32
    %160 = vector.broadcast %cst_39 : f32 to vector<16x64xf32>
    %161 = arith.addf %160, %159 : vector<16x64xf32>
    %162 = arith.mulf %151, %161 : vector<16x64xf32>
    %163 = arith.truncf %162 : vector<16x64xf32> to vector<16x64xbf16>
    %cst_40 = arith.constant dense<0.000000e+00> : vector<16x32xf32>
    %164 = tpu.matmul %163, %17, %cst_40 {dimension_numbers = #tpu.dot_dimension_numbers<[1], [0], [0], [1], [0, 0, 1, 1], [], []>} : vector<16x64xbf16>, vector<64x32xbf16>, vector<16x32xf32> -> vector<16x32xf32>
    %165 = vector.broadcast %10 : vector<1x32xf32> to vector<16x32xf32>
    %166 = arith.addf %164, %165 : vector<16x32xf32>
    %167 = arith.addf %145, %166 : vector<16x32xf32>
    %cst_41 = arith.constant dense<0.000000e+00> : vector<16xf32>
    %168 = vector.multi_reduction <add>, %167, %cst_41 [1] : vector<16x32xf32> to vector<16xf32>
    %169 = vector.shape_cast %168 : vector<16xf32> to vector<16x1xf32>
    %cst_42 = arith.constant 3.200000e+01 : f32
    %170 = vector.broadcast %cst_42 : f32 to vector<16x1xf32>
    %171 = arith.divf %169, %170 : vector<16x1xf32>
    %172 = vector.broadcast %171 : vector<16x1xf32> to vector<16x32xf32>
    %173 = arith.subf %167, %172 : vector<16x32xf32>
    %174 = arith.mulf %173, %173 : vector<16x32xf32>
    %cst_43 = arith.constant dense<0.000000e+00> : vector<16xf32>
    %175 = vector.multi_reduction <add>, %174, %cst_43 [1] : vector<16x32xf32> to vector<16xf32>
    %176 = vector.shape_cast %175 : vector<16xf32> to vector<16x1xf32>
    %cst_44 = arith.constant 3.200000e+01 : f32
    %177 = vector.broadcast %cst_44 : f32 to vector<16x1xf32>
    %178 = arith.divf %176, %177 : vector<16x1xf32>
    %cst_45 = arith.constant 9.99999974E-6 : f32
    %179 = vector.broadcast %cst_45 : f32 to vector<16x1xf32>
    %180 = arith.addf %178, %179 : vector<16x1xf32>
    %181 = math.rsqrt %180 : vector<16x1xf32>
    %182 = vector.broadcast %181 : vector<16x1xf32> to vector<16x32xf32>
    %183 = arith.mulf %173, %182 : vector<16x32xf32>
    %184 = vector.broadcast %7 : vector<1x32xf32> to vector<16x32xf32>
    %185 = arith.mulf %183, %184 : vector<16x32xf32>
    %186 = vector.broadcast %8 : vector<1x32xf32> to vector<16x32xf32>
    %187 = arith.addf %185, %186 : vector<16x32xf32>
    %188 = arith.truncf %13 : vector<8x16xf32> to vector<8x16xbf16>
    %189 = arith.truncf %187 : vector<16x32xf32> to vector<16x32xbf16>
    %cst_46 = arith.constant dense<0.000000e+00> : vector<8x32xf32>
    %190 = tpu.matmul %188, %189, %cst_46 {dimension_numbers = #tpu.dot_dimension_numbers<[1], [0], [0], [1], [0, 0, 1, 1], [], []>} : vector<8x16xbf16>, vector<16x32xbf16>, vector<8x32xf32> -> vector<8x32xf32>
    %191 = arith.truncf %190 : vector<8x32xf32> to vector<8x32xbf16>
    %cst_47 = arith.constant dense<0.000000e+00> : vector<8x128xf32>
    %192 = tpu.matmul %191, %18, %cst_47 {dimension_numbers = #tpu.dot_dimension_numbers<[1], [0], [0], [1], [0, 0, 1, 1], [], []>} : vector<8x32xbf16>, vector<32x128xbf16>, vector<8x128xf32> -> vector<8x128xf32>
    %193 = vector.broadcast %11 : vector<1x128xf32> to vector<8x128xf32>
    %194 = arith.addf %192, %193 : vector<8x128xf32>
    %c0_48 = arith.constant 0 : index
    %c0_49 = arith.constant 0 : index
    %195 = vector.load %arg3[%c0_48, %c0_49] : memref<8x128xf32, #tpu.memory_space<vmem>>, vector<8x128xf32>
    tpu.vector_store %arg3[%c0_48, %c0_49], %194 {strides = array<i32>} : memref<8x128xf32, #tpu.memory_space<vmem>>, vector<8x128xf32>,
    return
  }
}

</mosaic_0001>

<bundles_post_ra>
// kernel: tpu_custom_call.1
= control target key start
LH: loop header
LB: loop body
LE: loop exit
PB: predicated region body
PF: predicated region fallthrough
CT: control target
= control target key end

     0   :  { %8 = vsyncpa [#allocation3], 0  ;;  %s1820_s0 = inlined_call_operand.hbm [shape: f32[16,32], index: 0, kind: input, shape index: {}]   ;;  %s1821_s1 = inlined_call_operand.hbm [shape: bf16[192,128], index: 1, kind: input, shape index: {}]   ;;  %s1822_s2 = inlined_call_operand.hbm [shape: f32[40,128], index: 2, kind: input, shape index: {}]   ;;  %s1823_s3 = inlined_call_operand.hbm [shape: f32[8,128], index: 3, kind: output, shape index: {}]  }
   0x1   :  { %9 = vsyncpa [#allocation6], 0 }
   0x2   :  { %10 = vsyncpa [#allocation4], 0  ;;  %s1560_s12 = smov [#allocation5]   ;;  %s1466_s16 = scalar_lea.hbm %s1821_s1, 1536 }
   0x3   :  { %s28_s13 = sshll.u32 %s1560_s12, 4  ;;  %p1467_p0 = scmp.ne.s32.totalorder %s1821_s1, %s1466_s16  ;;  %s29_s13 = int_to_ptr.vmem [resolvable:$true] %s28_s13 }
   0x4   :  { %p1470_p1 = scmp.lt.u32.totalorder %s1466_s16, %s1821_s1 }
   0x6   :  { %p1472_p2 = pnand %p1470_p1, %p1467_p0 }
   0x8   :  { %1475 = shalt.err (!%p1472_p2)
}
   0x9   :  { %s1476_s21 = scalar_lea.vmem %s29_s13, 1536  ;;  %p1481_p4 = scmp.lt.s32.totalorder %s29_s13, %s29_s13 }
   0xa   :  { %p1477_p3 = scmp.ne.s32.totalorder %s29_s13, %s1476_s21  ;;  %p1482_p5 = scmp.lt.s32.totalorder %s1476_s21, %s1476_s21 }
   0xc   :  { %p1483_p6 = por %p1482_p5, %p1481_p4 }
   0xe   :  { %p1484_p7 = pnand %p1483_p6, %p1477_p3 }
  0x10   :  { %1487 = shalt.err (!%p1484_p7)
}
  0x11   :  { %s1561_s22 = smov 64   ;;  %s1562_s23 = smov 4  }
  0x12   :  { %34 = dma.hbm_to_vmem [thread:$0]  %s1821_s1, 1536, %s29_s13, [#allocation6], %s1561_s22, %s1561_s22, %s1562_s23  }
  0x13   :  { %s1563_s26 = smov [#allocation2]   ;;  %s1488_s30 = scalar_lea.hbm %s1820_s0, 256 }
  0x14   :  { %s16_s27 = sshll.u32 %s1563_s26, 4  ;;  %p1489_p8 = scmp.ne.s32.totalorder %s1820_s0, %s1488_s30  ;;  %s17_s27 = int_to_ptr.vmem [resolvable:$true] %s16_s27 }
  0x15   :  { %p1492_p9 = scmp.lt.u32.totalorder %s1488_s30, %s1820_s0 }
  0x17   :  { %p1494_p10 = pnand %p1492_p9, %p1489_p8 }
  0x19   :  { %1497 = shalt.err (!%p1494_p10)
}
  0x1a   :  { %s1498_s8 = scalar_lea.vmem %s17_s27, 256  ;;  %p1503_p12 = scmp.lt.s32.totalorder %s17_s27, %s17_s27 }
  0x1b   :  { %p1499_p11 = scmp.ne.s32.totalorder %s17_s27, %s1498_s8  ;;  %p1504_p13 = scmp.lt.s32.totalorder %s1498_s8, %s1498_s8 }
  0x1d   :  { %p1505_p0 = por %p1504_p13, %p1503_p12 }
  0x1f   :  { %p1506_p1 = pnand %p1505_p0, %p1499_p11 }
  0x21   :  { %1509 = shalt.err (!%p1506_p1)
}
  0x22   :  { %s1564_s1 = smov 128   ;;  %s1565_s9 = smov 8  }
  0x23   :  { %22 = dma.hbm_to_vmem [thread:$0]  %s1820_s0, 256, %s17_s27, [#allocation3], %s1564_s1, %s1564_s1, %s1565_s9  }
  0x24   :  { %s1566_s12 = smov [#allocation7]   ;;  %s1510_s16 = scalar_lea.hbm %s1822_s2, 640 }
  0x25   :  { %s40_s13 = sshll.u32 %s1566_s12, 4  ;;  %p1511_p2 = scmp.ne.s32.totalorder %s1822_s2, %s1510_s16  ;;  %s41_s13 = int_to_ptr.vmem [resolvable:$true] %s40_s13 }
  0x26   :  { %p1514_p3 = scmp.lt.u32.totalorder %s1510_s16, %s1822_s2 }
  0x28   :  { %p1516_p4 = pnand %p1514_p3, %p1511_p2 }
  0x2a   :  { %1519 = shalt.err (!%p1516_p4)
}
  0x2b   :  { %s1520_s21 = scalar_lea.vmem %s41_s13, 640  ;;  %p1525_p6 = scmp.lt.s32.totalorder %s41_s13, %s41_s13 }
  0x2c   :  { %p1521_p5 = scmp.ne.s32.totalorder %s41_s13, %s1520_s21  ;;  %p1526_p7 = scmp.lt.s32.totalorder %s1520_s21, %s1520_s21 }
  0x2e   :  { %p1527_p8 = por %p1526_p7, %p1525_p6 }
  0x30   :  { %p1528_p9 = pnand %p1527_p8, %p1521_p5 }
  0x32   :  { %1531 = shalt.err (!%p1528_p9)
}
  0x33   :  { %46 = dma.hbm_to_vmem [thread:$0]  %s1822_s2, 640, %s41_s13, [#allocation6], %s1564_s1, %s1564_s1, %s1565_s9  }
  0x34   :  { %1554 = dma.done.wait [#allocation3], 256  }
  0x35   :  { %1555 = vsyncadd [#allocation3], 4294967040 }
  0x36   :  { %1556 = dma.done.wait [#allocation6], 2176  }
  0x37   :  { %1557 = vsyncadd [#allocation6], 4294965120  ;;  %v1567_v0 = vmov 0.0   ;;  %vm1568_vm0 = vmmov 0   ;;  %v1412_v1 = vld [vmem:[#allocation5] sm:$0xff]   ;;  %v1413_v2 = vld [vmem:[#allocation5 + $0x8] sm:$0xff]   ;;  %v89_v6 = vlaneseq }
  0x38   :  { %1278 = vmatprep.subr.bf16.mxu0 %v1567_v0  ;;  %1282 = vmatprep.mubr.msk.bf16.mxu0 %vm1568_vm0, %v1567_v0  ;;  %v1644_v3 = vld [vmem:[#allocation2] sm:$0xff]  ;;  %v1646_v4 = vld [vmem:[#allocation2 + $0x8] sm:$0xff]  ;;  %vm105_vm1 = vcmask 261120   ;;  %v1658_v9 = vld [vmem:[#allocation7] sm:$0xff]  ;;  %s1569_s2 = smov 120   ;;  %s1570_s24 = smov 96  }
  0x39   :  { %1286 = vmatprep.subr.bf16.mxu1 %v1567_v0  ;;  %1288 = vmatprep.mubr.msk.bf16.mxu1 %vm1568_vm0, %v1567_v0  ;;  %v88_v5 = vpack.c.bf16 %v1646_v4, %v1644_v3  ;;  %v1655_v7 = vshrl.u32 %v89_v6, 7  ;;  %s1571_s25 = smov 88   ;;  %vm154_vm2 = vcmask 64512   ;;  %v1679_v24 = vld [vmem:[#allocation7 + $0x10] sm:$0xff]  ;;  %vm206_vm3 = vcmask 130048   ;;  %v1681_v28 = vld [vmem:[#allocation7 + $0x18] sm:$0xff] }
  0x3a   :  { %1279 = vmatpush3.bf16.msra.mxu0 %v1412_v1  ;;  %s1572_s26 = smov 56   ;;  %s1573_s27 = smov 80   ;;  %vm407_vm4 = vcmask 1043456   ;;  %vm1004_vm5 = vcmask 523264  }
  0x3b   :  { %1280 = vmatprep.subr.bf16.mxu0 %v1567_v0  ;;  %v91_v8 = vsub.s32 0, %v1655_v7  ;;  %s1574_s28 = smov 112   ;;  %s1576_s29 = smov 48  }
  0x3c   :  { %s1577_s30 = smov 104   ;;  %s1578_s4 = smov 40  }
  0x3d   :  { %v92_v10 = vrot.slane %v1658_v9, %v91_v8  ;;  %s1579_s5 = smov [#allocation8]  }
  0x3e   :  { %1281 = vmatpush3.bf16.msra.mxu0 %v1413_v2  ;;  %s1201_s6 = sshll.u32 %s1579_s5, 4  ;;  %s1202_s6 = int_to_ptr.vmem [resolvable:$true] %s1201_s6 }
  0x3f   :  { %1292 = vmatprep.subr.bf16.mxu0 %v1567_v0  ;;  %s1532_s7 = scalar_lea.vmem %s1202_s6, 128  ;;  %p1537_p11 = scmp.lt.s32.totalorder %s1202_s6, %s1202_s6 }
  0x40   :  { %p1533_p10 = scmp.ne.s32.totalorder %s1202_s6, %s1532_s7  ;;  %p1538_p12 = scmp.lt.s32.totalorder %s1532_s7, %s1532_s7 }
  0x41   :  { %1283 = vmatmul.mubr.msk.bf16.vlgmr.msra.gmra.mrb[0].mxu0 %vm105_vm1, %v88_v5 }
  0x42   :  { %1294 = vmatprep.mubr.msk.bf16.mxu0 %vm1568_vm0, %v1567_v0  ;;  %p1539_p13 = por %p1538_p12, %p1537_p11 }
  0x44   :  { %p1540_p0 = pnand %p1539_p13, %p1533_p10 }
 0x114   :  { %v143_v11 = vpop.f32.mrb[0].mxu0 }
 0x115   :  { %v1284_v12 = vpop.f32.mrb[1].mxu0  ;;  %v144_v14 = vadd.f32 %v143_v11, %v92_v10 }
 0x116   :  { %v146_v13 = vpop.f32.mrb[2].mxu0 }
 0x117   :  { %v147_v15 = vadd.f32 %v146_v13, %v92_v10  ;;  %v1285_v16 = vpop.f32.mrb[3].mxu0 }
 0x119   :  { %v1663_v17 = vpack.c.bf16 %v147_v15, %v144_v14 }
 0x11b   :  { %278 = vrot.lane.b32.xlu1 %v1663_v17, %s1569_s2  ;;  %152 = vrot.lane.b32.xlu0 %v1663_v17, %s1570_s24 }
 0x11f   :  { %280 = vrot.lane.b32.xlu0 %v1663_v17, %s1571_s25 }
 0x18d   :  { %v153_v18 = vpop.permute.xlu0 %152  ;;  %v279_v22 = vpop.permute.xlu1 %278 }
 0x18e   :  { %v159_v19 = vsel %vm154_vm2, %v153_v18, 0 }
 0x18f   :  { %1287 = vmatpush3.bf16.xpose.msra.mxu1 %v159_v19 }
 0x190   :  { %1298 = vmatprep.subr.bf16.mxu1 %v1567_v0 }
 0x191   :  { %v281_v20 = vpop.permute.xlu0 %280 }
 0x192   :  { %v286_v21 = vsel %vm154_vm2, %v281_v20, 0 }
 0x196   :  { %1289 = vmatmul.mubr.msk.bf16.vlgmr.msra.gmra.mrb[0].mxu1 %vm154_vm2, %v1663_v17 }
 0x197   :  { %1299 = vmatpush3.bf16.xpose.msra.mxu1 %v286_v21  ;;  %1300 = vmatprep.mubr.msk.bf16.mxu1 %vm1568_vm0, %v1567_v0 }
 0x198   :  { %1310 = vmatprep.subr.bf16.mxu1 %v1567_v0 }
 0x19e   :  { %1301 = vmatmul.mubr.msk.bf16.vlgmr.msra.gmra.mrb[4].mxu1 %vm154_vm2, %v279_v22 }
 0x19f   :  { %1312 = vmatprep.mubr.msk.bf16.mxu1 %vm1568_vm0, %v1567_v0 }
 0x269   :  { %v195_v23 = vpop.f32.mrb[0].mxu1 }
 0x26a   :  { %v202_v25 = vmul.f32 0.35355338, %v195_v23  ;;  %v1290_v26 = vpop.f32.mrb[1].mxu1 }
 0x26b   :  { %v198_v27 = vpop.f32.mrb[2].mxu1 }
 0x26c   :  { %v203_v29 = vmul.f32 0.35355338, %v198_v27  ;;  %v1291_v30 = vpop.f32.mrb[3].mxu1  ;;  %v204_v31 = vadd.f32 %v202_v25, %v1679_v24  ;;  %v68_v25 = vld [vmem:[#allocation5 + $0x10] sm:$0xf] }
 0x26d   :  { %v456_v26 = vsel %vm407_vm4, %v68_v25, 0  ;;  %v69_v27 = vld [vmem:[#allocation5 + $0x14] sm:$0xf] }
 0x26e   :  { %v207_v32 = vsel %vm206_vm3, %v204_v31, -inf  ;;  %v205_v33 = vadd.f32 %v203_v29, %v1681_v28  ;;  %v409_v29 = vsel %vm407_vm4, %v69_v27, 0 }
 0x26f   :  { %208 = vmax.xlane.f32.xlu1 %v207_v32  ;;  %1311 = vmatpush3.bf16.msra.mxu1 %v409_v29  ;;  %v70_v29 = vld [vmem:[#allocation5 + $0x18] sm:$0xf] }
 0x270   :  { %v210_v34 = vsel %vm206_vm3, %v205_v33, -inf  ;;  %1322 = vmatprep.subr.bf16.mxu1 %v1567_v0 }
 0x271   :  { %211 = vmax.xlane.f32.xlu0 %v210_v34  ;;  %v322_v35 = vpop.f32.mrb[4].mxu1 }
 0x272   :  { %v329_v36 = vmul.f32 0.35355338, %v322_v35  ;;  %v1302_v37 = vpop.f32.mrb[5].mxu1 }
 0x273   :  { %v325_v38 = vpop.f32.mrb[6].mxu1 }
 0x274   :  { %v330_v39 = vmul.f32 0.35355338, %v325_v38  ;;  %v1303_v40 = vpop.f32.mrb[7].mxu1  ;;  %v331_v41 = vadd.f32 %v329_v36, %v1679_v24 }
 0x276   :  { %v333_v42 = vsel %vm206_vm3, %v331_v41, -inf  ;;  %v332_v43 = vadd.f32 %v330_v39, %v1681_v28 }
 0x277   :  { %334 = vmax.xlane.f32.xlu0 %v333_v42 }
 0x278   :  { %v336_v44 = vsel %vm206_vm3, %v332_v43, -inf }
 0x279   :  { %337 = vmax.xlane.f32.xlu1 %v336_v44 }
 0x2fc   :  { %v209_v45 = vpop.xlane.xlu1 %208 }
 0x2fd   :  { %v213_v46 = vsub.f32 %v204_v31, %v209_v45 }
 0x2fe   :  { %v212_v47 = vpop.xlane.xlu0 %211 }
 0x2ff   :  { %v215_v48 = vmul.f32 1.442695, %v213_v46  ;;  %v214_v49 = vsub.f32 %v205_v33, %v212_v47 }
 0x301   :  { %1422 = vpow2.f32 %v215_v48  ;;  %v217_v50 = vmul.f32 1.442695, %v214_v49 }
 0x303   :  { %1424 = vpow2.f32 %v217_v50 }
 0x304   :  { %v335_v51 = vpop.xlane.xlu0 %334 }
 0x305   :  { %v339_v52 = vsub.f32 %v331_v41, %v335_v51 }
 0x306   :  { %v338_v53 = vpop.xlane.xlu1 %337 }
 0x307   :  { %v341_v54 = vmul.f32 1.442695, %v339_v52  ;;  %v340_v55 = vsub.f32 %v332_v43, %v338_v53 }
 0x309   :  { %1426 = vpow2.f32 %v341_v54  ;;  %v343_v56 = vmul.f32 1.442695, %v340_v55 }
 0x30b   :  { %v1423_v57 = vpop.eup %1422  ;;  %1428 = vpow2.f32 %v343_v56 }
 0x30c   :  { %v219_v58 = vsel %vm206_vm3, %v1423_v57, 0.0 }
 0x30d   :  { %v1425_v59 = vpop.eup %1424  ;;  %220 = vadd.xlane.f32.xlu0 %v219_v58 }
 0x30e   :  { %v222_v60 = vsel %vm206_vm3, %v1425_v59, 0.0 }
 0x30f   :  { %223 = vadd.xlane.f32.xlu1 %v222_v60 }
 0x313   :  { %v1427_v61 = vpop.eup %1426 }
 0x314   :  { %v345_v62 = vsel %vm206_vm3, %v1427_v61, 0.0 }
 0x315   :  { %v1429_v63 = vpop.eup %1428  ;;  %346 = vadd.xlane.f32.xlu0 %v345_v62 }
 0x316   :  { %v348_v1 = vsel %vm206_vm3, %v1429_v63, 0.0 }
 0x317   :  { %349 = vadd.xlane.f32.xlu1 %v348_v1 }
 0x328   :  { %356 = vrot.lane.b32.xlu1 %v1663_v17, %s1572_s26 }
 0x32b   :  { %230 = vrot.lane.b32.xlu0 %v1663_v17, %s1561_s22  ;;  %s1575_s22 = smov 72  }
 0x32c   :  { %501 = vrot.lane.b32.xlu1 %v1663_v17, %s1573_s27 }
 0x32f   :  { %499 = vrot.lane.b32.xlu0 %v1663_v17, %s1574_s28 }
 0x39a   :  { %v221_v2 = vpop.xlane.xlu0 %220 }
 0x39b   :  { %1430 = vrcp.f32 %v221_v2 }
 0x39c   :  { %v224_v5 = vpop.xlane.xlu1 %223 }
 0x39d   :  { %1432 = vrcp.f32 %v224_v5 }
 0x3a2   :  { %v347_v6 = vpop.xlane.xlu0 %346 }
 0x3a3   :  { %1434 = vrcp.f32 %v347_v6 }
 0x3a4   :  { %v350_v10 = vpop.xlane.xlu1 %349 }
 0x3a5   :  { %v1431_v11 = vpop.eup %1430  ;;  %1436 = vrcp.f32 %v350_v10 }
 0x3a6   :  { %v231_v12 = vpop.permute.xlu0 %230  ;;  %v227_v14 = vmul.f32 %v1431_v11, %v1423_v57 }
 0x3a7   :  { %v1433_v13 = vpop.eup %1432  ;;  %1293 = vmatpush3.bf16.msra.mxu0 %v231_v12 }
 0x3a8   :  { %v228_v15 = vmul.f32 %v1433_v13, %v1425_v59  ;;  %1304 = vmatprep.subr.bf16.mxu0 %v1567_v0  ;;  %v357_v18 = vpop.permute.xlu1 %356 }
 0x3aa   :  { %v229_v16 = vpack.c.bf16 %v228_v15, %v227_v14  ;;  %v500_v42 = vpop.permute.xlu0 %499 }
 0x3ac   :  { %1295 = vmatmul.mubr.msk.bf16.vlgmr.msra.gmra.mrb[4].mxu0 %vm206_vm3, %v229_v16  ;;  %v502_v37 = vpop.permute.xlu1 %501 }
 0x3ad   :  { %v1435_v19 = vpop.eup %1434  ;;  %1305 = vmatpush3.bf16.msra.mxu0 %v357_v18  ;;  %1306 = vmatprep.mubr.msk.bf16.mxu0 %vm1568_vm0, %v1567_v0  ;;  %v507_v41 = vsel %vm154_vm2, %v502_v37, 0 }
 0x3ae   :  { %1316 = vmatprep.subr.bf16.mxu0 %v1567_v0  ;;  %v353_v21 = vmul.f32 %v1435_v19, %v1427_v61 }
 0x3af   :  { %v1437_v20 = vpop.eup %1436 }
 0x3b0   :  { %v354_v22 = vmul.f32 %v1437_v20, %v1429_v63 }
 0x3b2   :  { %v355_v23 = vpack.c.bf16 %v354_v22, %v353_v21 }
 0x3b4   :  { %1307 = vmatmul.mubr.msk.bf16.vlgmr.msra.gmra.mrb[8].mxu0 %vm206_vm3, %v355_v23 }
 0x3b5   :  { %1318 = vmatprep.mubr.msk.bf16.mxu0 %vm1568_vm0, %v1567_v0  ;;  %1317 = vmatpush3.bf16.msra.mxu0 %v456_v26 }
 0x3b6   :  { %1328 = vmatprep.subr.bf16.mxu0 %v1567_v0 }
 0x47f   :  { %v270_v30 = vpop.f32.mrb[4].mxu0 }
 0x480   :  { %v1296_v31 = vpop.f32.mrb[5].mxu0 }
 0x481   :  { %v273_v32 = vpop.f32.mrb[6].mxu0 }
 0x482   :  { %v277_v33 = vpack.c.bf16 %v273_v32, %v270_v30  ;;  %v1297_v34 = vpop.f32.mrb[7].mxu0  ;;  %v629_v30 = vsel %vm407_vm4, %v70_v29, 0 }
 0x484   :  { %1319 = vmatmul.mubr.msk.bf16.vlgmr.msra.gmra.mrb[12].mxu0 %vm154_vm2, %v277_v33 }
 0x485   :  { %1330 = vmatprep.mubr.msk.bf16.mxu0 %vm1568_vm0, %v1567_v0 }
 0x487   :  { %v396_v35 = vpop.f32.mrb[8].mxu0 }
 0x488   :  { %v1308_v36 = vpop.f32.mrb[9].mxu0 }
 0x489   :  { %v399_v38 = vpop.f32.mrb[10].mxu0 }
 0x48a   :  { %v403_v39 = vpack.c.bf16 %v399_v38, %v396_v35  ;;  %v1309_v40 = vpop.f32.mrb[11].mxu0 }
 0x48c   :  { %1313 = vmatmul.mubr.msk.bf16.vlgmr.msra.gmra.mrb[8].mxu1 %vm154_vm2, %v403_v39 }
 0x48d   :  { %1323 = vmatpush3.bf16.xpose.msra.mxu1 %v507_v41  ;;  %1324 = vmatprep.mubr.msk.bf16.mxu1 %vm1568_vm0, %v1567_v0 }
 0x48e   :  { %1334 = vmatprep.subr.bf16.mxu1 %v1567_v0 }
 0x494   :  { %1325 = vmatmul.mubr.msk.bf16.vlgmr.msra.gmra.mrb[12].mxu1 %vm154_vm2, %v500_v42 }
 0x495   :  { %1336 = vmatprep.mubr.msk.bf16.mxu1 %vm1568_vm0, %v1567_v0  ;;  %1335 = vmatpush3.bf16.msra.mxu1 %v629_v30 }
 0x496   :  { %1346 = vmatprep.subr.bf16.mxu1 %v1567_v0 }
 0x557   :  { %v492_v43 = vpop.f32.mrb[12].mxu0 }
 0x558   :  { %v1320_v44 = vpop.f32.mrb[13].mxu0 }
 0x559   :  { %v495_v45 = vpop.f32.mrb[14].mxu0 }
 0x55a   :  { %v1321_v46 = vpop.f32.mrb[15].mxu0 }
 0x55f   :  { %v445_v47 = vpop.f32.mrb[8].mxu1 }
 0x560   :  { %v1723_v48 = vadd.f32 %v492_v43, %v445_v47  ;;  %v1314_v49 = vpop.f32.mrb[9].mxu1 }
 0x561   :  { %v448_v50 = vpop.f32.mrb[10].mxu1 }
 0x562   :  { %v1725_v51 = vadd.f32 %v495_v45, %v448_v50  ;;  %v1315_v52 = vpop.f32.mrb[11].mxu1 }
 0x567   :  { %v543_v53 = vpop.f32.mrb[12].mxu1 }
 0x568   :  { %v550_v54 = vmul.f32 0.35355338, %v543_v53  ;;  %v1326_v55 = vpop.f32.mrb[13].mxu1 }
 0x569   :  { %v546_v56 = vpop.f32.mrb[14].mxu1 }
 0x56a   :  { %v551_v57 = vmul.f32 0.35355338, %v546_v56  ;;  %v1327_v58 = vpop.f32.mrb[15].mxu1  ;;  %v552_v59 = vadd.f32 %v550_v54, %v1679_v24 }
 0x56c   :  { %v554_v60 = vsel %vm206_vm3, %v552_v59, -inf  ;;  %v553_v61 = vadd.f32 %v551_v57, %v1681_v28 }
 0x56d   :  { %555 = vmax.xlane.f32.xlu1 %v554_v60 }
 0x56e   :  { %v557_v62 = vsel %vm206_vm3, %v553_v61, -inf }
 0x56f   :  { %558 = vmax.xlane.f32.xlu0 %v557_v62 }
 0x5fa   :  { %v556_v63 = vpop.xlane.xlu1 %555 }
 0x5fb   :  { %v560_v1 = vsub.f32 %v552_v59, %v556_v63 }
 0x5fc   :  { %v559_v2 = vpop.xlane.xlu0 %558 }
 0x5fd   :  { %v562_v5 = vmul.f32 1.442695, %v560_v1  ;;  %v561_v6 = vsub.f32 %v553_v61, %v559_v2 }
 0x5ff   :  { %1438 = vpow2.f32 %v562_v5  ;;  %v564_v10 = vmul.f32 1.442695, %v561_v6 }
 0x601   :  { %1440 = vpow2.f32 %v564_v10 }
 0x609   :  { %v1439_v11 = vpop.eup %1438 }
 0x60a   :  { %v566_v12 = vsel %vm206_vm3, %v1439_v11, 0.0 }
 0x60b   :  { %v1441_v13 = vpop.eup %1440  ;;  %567 = vadd.xlane.f32.xlu0 %v566_v12 }
 0x60c   :  { %v569_v14 = vsel %vm206_vm3, %v1441_v13, 0.0 }
 0x60d   :  { %570 = vadd.xlane.f32.xlu1 %v569_v14 }
 0x61e   :  { %676 = vrot.lane.b32.xlu1 %v1663_v17, %s1575_s22 }
 0x621   :  { %577 = vrot.lane.b32.xlu0 %v1663_v17, %s1576_s29 }
 0x622   :  { %674 = vrot.lane.b32.xlu1 %v1663_v17, %s1577_s30 }
 0x698   :  { %v568_v15 = vpop.xlane.xlu0 %567 }
 0x699   :  { %1442 = vrcp.f32 %v568_v15 }
 0x69a   :  { %v571_v16 = vpop.xlane.xlu1 %570 }
 0x69b   :  { %1444 = vrcp.f32 %v571_v16  ;;  %v851_v16 = vsub.s32 1, %v1655_v7 }
 0x69c   :  { %v578_v18 = vpop.permute.xlu0 %577 }
 0x69d   :  { %1329 = vmatpush3.bf16.msra.mxu0 %v578_v18  ;;  %v852_v18 = vrot.slane %v1658_v9, %v851_v16 }
 0x69e   :  { %1340 = vmatprep.subr.bf16.mxu0 %v1567_v0  ;;  %v677_v23 = vpop.permute.xlu1 %676 }
 0x69f   :  { %v682_v26 = vsel %vm154_vm2, %v677_v23, 0 }
 0x6a2   :  { %v675_v27 = vpop.permute.xlu1 %674 }
 0x6a3   :  { %v1443_v19 = vpop.eup %1442 }
 0x6a4   :  { %v574_v21 = vmul.f32 %v1443_v19, %v1439_v11 }
 0x6a5   :  { %v1445_v20 = vpop.eup %1444 }
 0x6a6   :  { %v575_v22 = vmul.f32 %v1445_v20, %v1441_v13 }
 0x6a8   :  { %v576_v25 = vpack.c.bf16 %v575_v22, %v574_v21 }
 0x6aa   :  { %1331 = vmatmul.mubr.msk.bf16.vlgmr.msra.gmra.mrb[16].mxu0 %vm206_vm3, %v576_v25 }
 0x6ab   :  { %1341 = vmatpush3.bf16.xpose.msra.mxu0 %v682_v26  ;;  %1342 = vmatprep.mubr.msk.bf16.mxu0 %vm1568_vm0, %v1567_v0 }
 0x6ac   :  { %1352 = vmatprep.subr.bf16.mxu0 %v1567_v0 }
 0x6b2   :  { %1343 = vmatmul.mubr.msk.bf16.vlgmr.msra.gmra.mrb[20].mxu0 %vm154_vm2, %v675_v27 }
 0x6b3   :  { %1354 = vmatprep.mubr.msk.bf16.mxu0 %vm1568_vm0, %v1567_v0 }
 0x77d   :  { %v617_v31 = vpop.f32.mrb[16].mxu0 }
 0x77e   :  { %v1332_v32 = vpop.f32.mrb[17].mxu0 }
 0x77f   :  { %v620_v33 = vpop.f32.mrb[18].mxu0 }
 0x780   :  { %v624_v34 = vpack.c.bf16 %v620_v33, %v617_v31  ;;  %v1333_v35 = vpop.f32.mrb[19].mxu0 }
 0x782   :  { %1337 = vmatmul.mubr.msk.bf16.vlgmr.msra.gmra.mrb[16].mxu1 %vm154_vm2, %v624_v34 }
 0x783   :  { %1348 = vmatprep.mubr.msk.bf16.mxu1 %vm1568_vm0, %v1567_v0 }
 0x785   :  { %v718_v36 = vpop.f32.mrb[20].mxu0 }
 0x786   :  { %v725_v37 = vmul.f32 0.35355338, %v718_v36  ;;  %v1344_v38 = vpop.f32.mrb[21].mxu0 }
 0x787   :  { %v721_v39 = vpop.f32.mrb[22].mxu0 }
 0x788   :  { %v726_v40 = vmul.f32 0.35355338, %v721_v39  ;;  %v1345_v41 = vpop.f32.mrb[23].mxu0  ;;  %v727_v42 = vadd.f32 %v725_v37, %v1679_v24 }
 0x78a   :  { %v729_v43 = vsel %vm206_vm3, %v727_v42, -inf  ;;  %v728_v44 = vadd.f32 %v726_v40, %v1681_v28 }
 0x78b   :  { %730 = vmax.xlane.f32.xlu0 %v729_v43 }
 0x78c   :  { %v732_v45 = vsel %vm206_vm3, %v728_v44, -inf }
 0x78d   :  { %733 = vmax.xlane.f32.xlu1 %v732_v45 }
 0x79e   :  { %752 = vrot.lane.b32.xlu1 %v1663_v17, %s1578_s4 }
 0x818   :  { %v731_v46 = vpop.xlane.xlu0 %730 }
 0x819   :  { %v735_v47 = vsub.f32 %v727_v42, %v731_v46  ;;  %v1414_v42 = vld [vmem:[#allocation5 + $0x20] sm:$0xff]  }
 0x81a   :  { %v734_v49 = vpop.xlane.xlu1 %733 }
 0x81b   :  { %v737_v50 = vmul.f32 1.442695, %v735_v47  ;;  %v736_v52 = vsub.f32 %v728_v44, %v734_v49 }
 0x81d   :  { %1446 = vpow2.f32 %v737_v50  ;;  %v739_v53 = vmul.f32 1.442695, %v736_v52  ;;  %v886_v50 = vsub.s32 2, %v1655_v7 }
 0x81e   :  { %v753_v54 = vpop.permute.xlu1 %752 }
 0x81f   :  { %1448 = vpow2.f32 %v739_v53  ;;  %1347 = vmatpush3.bf16.msra.mxu1 %v753_v54  ;;  %v887_v53 = vrot.slane %v1658_v9, %v886_v50 }
 0x820   :  { %1358 = vmatprep.subr.bf16.mxu1 %v1567_v0 }
 0x827   :  { %v1447_v24 = vpop.eup %1446 }
 0x828   :  { %v741_v28 = vsel %vm206_vm3, %v1447_v24, 0.0 }
 0x829   :  { %v1449_v55 = vpop.eup %1448  ;;  %742 = vadd.xlane.f32.xlu0 %v741_v28 }
 0x82a   :  { %v744_v56 = vsel %vm206_vm3, %v1449_v55, 0.0 }
 0x82d   :  { %745 = vadd.xlane.f32.xlu0 %v744_v56 }
 0x855   :  { %v665_v17 = vpop.f32.mrb[16].mxu1 }
 0x856   :  { %v672_v57 = vadd.f32 %v665_v17, %v1723_v48  ;;  %v1338_v58 = vpop.f32.mrb[17].mxu1  ;;  %v71_v48 = vld [vmem:[#allocation5 + $0x1c] sm:$0xf] }
 0x857   :  { %v668_v59 = vpop.f32.mrb[18].mxu1  ;;  %v804_v11 = vsel %vm407_vm4, %v71_v48, 0 }
 0x858   :  { %v673_v60 = vadd.f32 %v668_v59, %v1725_v51  ;;  %v1339_v61 = vpop.f32.mrb[19].mxu1  ;;  %1353 = vmatpush3.bf16.msra.mxu0 %v804_v11 }
 0x859   :  { %1366 = vmatprep.subr.bf16.mxu0 %v1567_v0  ;;  %v1416_v61 = vld [vmem:[#allocation5 + $0x30] sm:$0xff]  }
 0x8b6   :  { %v743_v62 = vpop.xlane.xlu0 %742 }
 0x8b7   :  { %1450 = vrcp.f32 %v743_v62  ;;  %v1417_v62 = vld [vmem:[#allocation5 + $0x38] sm:$0xff]  }
 0x8ba   :  { %v746_v63 = vpop.xlane.xlu0 %745 }
 0x8bb   :  { %1452 = vrcp.f32 %v746_v63  ;;  %v1418_v63 = vld [vmem:[#allocation5 + $0x40] sm:$0xff]  }
 0x8c1   :  { %v1451_v1 = vpop.eup %1450 }
 0x8c2   :  { %v749_v5 = vmul.f32 %v1451_v1, %v1447_v24  ;;  %v892_v24 = vsub.s32 3, %v1655_v7  ;;  %v1419_v1 = vld [vmem:[#allocation5 + $0x48] sm:$0xff]  }
 0x8c4   :  { %v893_v17 = vrot.slane %v1658_v9, %v892_v24 }
 0x8c5   :  { %v1453_v2 = vpop.eup %1452 }
 0x8c6   :  { %v750_v6 = vmul.f32 %v1453_v2, %v1449_v55  ;;  %v899_v2 = vsub.s32 6, %v1655_v7 }
 0x8c8   :  { %v751_v10 = vpack.c.bf16 %v750_v6, %v749_v5  ;;  %v900_v5 = vrot.slane %v1658_v9, %v899_v2 }
 0x8ca   :  { %1349 = vmatmul.mubr.msk.bf16.vlgmr.msra.gmra.mrb[20].mxu1 %vm206_vm3, %v751_v10 }
 0x8cb   :  { %1362 = vmatprep.mubr.msk.bf16.mxu1 %vm1568_vm0, %v1567_v0  ;;  %1359 = vmatpush3.bf16.msra.mxu1 %v1414_v42 }
 0x8cc   :  { %1360 = vmatprep.subr.bf16.mxu1 %v1567_v0 }
 0x99d   :  { %v792_v51 = vpop.f32.mrb[20].mxu1 }
 0x99e   :  { %v1350_v12 = vpop.f32.mrb[21].mxu1 }
 0x99f   :  { %v795_v13 = vpop.f32.mrb[22].mxu1 }
 0x9a0   :  { %v799_v14 = vpack.c.bf16 %v795_v13, %v792_v51  ;;  %v1351_v15 = vpop.f32.mrb[23].mxu1 }
 0x9a2   :  { %1355 = vmatmul.mubr.msk.bf16.vlgmr.msra.gmra.mrb[24].mxu0 %vm154_vm2, %v799_v14 }
 0x9a3   :  { %1374 = vmatprep.mubr.msk.bf16.mxu0 %vm1568_vm0, %v1567_v0  ;;  %1367 = vmatpush3.bf16.msra.mxu0 %v1416_v61 }
 0x9a4   :  { %1368 = vmatprep.subr.bf16.mxu0 %v1567_v0 }
 0x9a7   :  { %1369 = vmatpush3.bf16.msra.mxu0 %v1417_v62 }
 0x9a8   :  { %1370 = vmatprep.subr.bf16.mxu0 %v1567_v0 }
 0x9ab   :  { %1371 = vmatpush3.bf16.msra.mxu0 %v1418_v63 }
 0x9ac   :  { %1372 = vmatprep.subr.bf16.mxu0 %v1567_v0 }
 0x9af   :  { %1373 = vmatpush3.bf16.msra.mxu0 %v1419_v1  ;;  %v1085_v1 = vsub.s32 5, %v1655_v7 }
 0xa75   :  { %v840_v19 = vpop.f32.mrb[24].mxu0 }
 0xa76   :  { %v847_v20 = vadd.f32 %v840_v19, %v672_v57  ;;  %v1356_v21 = vpop.f32.mrb[25].mxu0 }
 0xa77   :  { %v843_v22 = vpop.f32.mrb[26].mxu0 }
 0xa78   :  { %v853_v23 = vadd.f32 %v852_v18, %v847_v20  ;;  %v848_v25 = vadd.f32 %v843_v22, %v673_v60  ;;  %v1357_v26 = vpop.f32.mrb[27].mxu0 }
 0xa7a   :  { %v854_v27 = vadd.f32 %v852_v18, %v848_v25  ;;  %v855_v29 = vadd.f32 %v853_v23, %v1644_v3 }
 0xa7c   :  { %v857_v30 = vsel %vm105_vm1, %v855_v29, 0.0  ;;  %v856_v31 = vadd.f32 %v854_v27, %v1646_v4  ;;  %v1415_v4 = vld [vmem:[#allocation5 + $0x28] sm:$0xff]  }
 0xa7d   :  { %858 = vadd.xlane.f32.xlu0 %v857_v30  ;;  %1361 = vmatpush3.bf16.msra.mxu1 %v1415_v4 }
 0xa7e   :  { %v860_v32 = vsel %vm105_vm1, %v856_v31, 0.0  ;;  %1378 = vmatprep.subr.bf16.mxu1 %v1567_v0 }
 0xa81   :  { %861 = vadd.xlane.f32.xlu0 %v860_v32 }
 0xb0a   :  { %v859_v33 = vpop.xlane.xlu0 %858 }
 0xb0b   :  { %v864_v34 = vmul.f32 0.03125, %v859_v33 }
 0xb0d   :  { %v866_v35 = vsub.f32 %v855_v29, %v864_v34 }
 0xb0e   :  { %v862_v36 = vpop.xlane.xlu0 %861 }
 0xb0f   :  { %v865_v37 = vmul.f32 0.03125, %v862_v36  ;;  %v868_v38 = vmul.f32 %v866_v35, %v866_v35 }
 0xb11   :  { %v867_v39 = vsub.f32 %v856_v31, %v865_v37  ;;  %v870_v40 = vsel %vm105_vm1, %v868_v38, 0.0 }
 0xb12   :  { %871 = vadd.xlane.f32.xlu0 %v870_v40 }
 0xb13   :  { %v869_v41 = vmul.f32 %v867_v39, %v867_v39 }
 0xb15   :  { %v873_v3 = vsel %vm105_vm1, %v869_v41, 0.0 }
 0xb16   :  { %874 = vadd.xlane.f32.xlu0 %v873_v3 }
 0xb9f   :  { %v872_v43 = vpop.xlane.xlu0 %871 }
 0xba0   :  { %v876_v44 = vmul.f32 0.03125, %v872_v43 }
 0xba2   :  { %v878_v45 = vadd.f32 1e-05, %v876_v44 }
 0xba3   :  { %v875_v46 = vpop.xlane.xlu0 %874 }
 0xba4   :  { %1454 = vrsqrt.f32 %v878_v45  ;;  %v877_v47 = vmul.f32 0.03125, %v875_v46 }
 0xba6   :  { %v879_v49 = vadd.f32 1e-05, %v877_v47 }
 0xba8   :  { %1456 = vrsqrt.f32 %v879_v49 }
 0xbae   :  { %v1455_v52 = vpop.eup %1454 }
 0xbaf   :  { %v882_v54 = vmul.f32 %v1455_v52, %v866_v35  ;;  %v978_v35 = vsub.s32 7, %v1655_v7 }
 0xbb1   :  { %v888_v55 = vmul.f32 %v887_v53, %v882_v54  ;;  %v979_v36 = vrot.slane %v1658_v9, %v978_v35 }
 0xbb2   :  { %v1457_v28 = vpop.eup %1456 }
 0xbb3   :  { %v883_v56 = vmul.f32 %v1457_v28, %v867_v39  ;;  %v894_v58 = vadd.f32 %v893_v17, %v888_v55 }
 0xbb5   :  { %v889_v57 = vmul.f32 %v887_v53, %v883_v56 }
 0xbb7   :  { %v895_v59 = vadd.f32 %v893_v17, %v889_v57 }
 0xbb9   :  { %v896_v60 = vpack.c.bf16 %v895_v59, %v894_v58 }
 0xbbb   :  { %1363 = vmatmul.mubr.msk.bf16.vlgmr.msra.gmra.mrb[24].mxu1 %vm105_vm1, %v896_v60  ;;  %v1079_v60 = vsub.s32 4, %v1655_v7 }
 0xbbc   :  { %1380 = vmatprep.mubr.msk.bf16.mxu1 %vm1568_vm0, %v1567_v0 }
 0xbbd   :  { %v1080_v63 = vrot.slane %v1658_v9, %v1079_v60 }
 0xc8e   :  { %v950_v6 = vpop.f32.mrb[24].mxu1 }
 0xc8f   :  { %v951_v10 = vadd.f32 %v950_v6, %v900_v5  ;;  %v1364_v48 = vpop.f32.mrb[25].mxu1 }
 0xc90   :  { %v953_v11 = vpop.f32.mrb[26].mxu1 }
 0xc91   :  { %v959_v51 = vmul.f32 0.044715, %v951_v10  ;;  %v954_v12 = vadd.f32 %v953_v11, %v900_v5  ;;  %v1365_v13 = vpop.f32.mrb[27].mxu1  ;;  %v957_v29 = vmul.f32 0.5, %v951_v10 }
 0xc93   :  { %v961_v14 = vmul.f32 %v959_v51, %v951_v10  ;;  %v960_v15 = vmul.f32 0.044715, %v954_v12  ;;  %v958_v30 = vmul.f32 0.5, %v954_v12 }
 0xc95   :  { %v963_v16 = vmul.f32 %v961_v14, %v951_v10  ;;  %v962_v18 = vmul.f32 %v960_v15, %v954_v12  ;;  %v1420_v15 = vld [vmem:[#allocation5 + $0x50] sm:$0xff]  }
 0xc97   :  { %v965_v19 = vadd.f32 %v963_v16, %v951_v10  ;;  %v964_v20 = vmul.f32 %v962_v18, %v954_v12  ;;  %v1086_v10 = vrot.slane %v1658_v9, %v1085_v1  ;;  %v1421_v16 = vld [vmem:[#allocation5 + $0x58] sm:$0xff]  }
 0xc99   :  { %v967_v21 = vmul.f32 0.7978846, %v965_v19  ;;  %v966_v22 = vadd.f32 %v964_v20, %v954_v12  ;;  %v63_v12 = vld [vmem:[#allocation7 + $0x20] sm:$0xff] }
 0xc9a   :  { %v1089_v14 = vpack.c.bf16 %v63_v12, %v63_v12 }
 0xc9b   :  { %1458 = vtanh.f32 %v967_v21  ;;  %v968_v23 = vmul.f32 0.7978846, %v966_v22  ;;  %v60_v22 = vld [vmem:[#allocation7 + $0x8] sm:$0xff] }
 0xc9d   :  { %1460 = vtanh.f32 %v968_v23  ;;  %v1138_v23 = vrot.slane %v60_v22, %v91_v8 }
 0xca5   :  { %v1459_v25 = vpop.eup %1458 }
 0xca6   :  { %v971_v26 = vadd.f32 1.0, %v1459_v25 }
 0xca7   :  { %v1461_v27 = vpop.eup %1460 }
 0xca8   :  { %v972_v31 = vadd.f32 1.0, %v1461_v27  ;;  %v973_v32 = vmul.f32 %v971_v26, %v957_v29 }
 0xcaa   :  { %v974_v33 = vmul.f32 %v972_v31, %v958_v30 }
 0xcac   :  { %v975_v34 = vpack.c.bf16 %v974_v33, %v973_v32 }
 0xcae   :  { %1375 = vmatmul.mubr.msk.bf16.vlgmr.msra.gmra.mrb[28].mxu0 %vm1004_vm5, %v975_v34 }
 0xd81   :  { %v1042_v37 = vpop.f32.mrb[28].mxu0 }
 0xd82   :  { %v1043_v38 = vadd.f32 %v1042_v37, %v979_v36  ;;  %v1376_v39 = vpop.f32.mrb[29].mxu0 }
 0xd83   :  { %v1045_v40 = vpop.f32.mrb[30].mxu0 }
 0xd84   :  { %v1046_v41 = vadd.f32 %v1045_v40, %v979_v36  ;;  %v1377_v3 = vpop.f32.mrb[31].mxu0  ;;  %v1049_v42 = vadd.f32 %v1043_v38, %v894_v58 }
 0xd86   :  { %v1051_v4 = vsel %vm105_vm1, %v1049_v42, 0.0  ;;  %v1050_v43 = vadd.f32 %v1046_v41, %v895_v59 }
 0xd87   :  { %1052 = vadd.xlane.f32.xlu1 %v1051_v4 }
 0xd88   :  { %v1054_v44 = vsel %vm105_vm1, %v1050_v43, 0.0 }
 0xd89   :  { %1055 = vadd.xlane.f32.xlu0 %v1054_v44 }
 0xe14   :  { %v1053_v45 = vpop.xlane.xlu1 %1052 }
 0xe15   :  { %v1057_v46 = vmul.f32 0.03125, %v1053_v45 }
 0xe16   :  { %v1056_v47 = vpop.xlane.xlu0 %1055 }
 0xe17   :  { %v1059_v49 = vsub.f32 %v1049_v42, %v1057_v46  ;;  %v1058_v50 = vmul.f32 0.03125, %v1056_v47 }
 0xe19   :  { %v1060_v52 = vsub.f32 %v1050_v43, %v1058_v50  ;;  %v1061_v53 = vmul.f32 %v1059_v49, %v1059_v49 }
 0xe1b   :  { %v1063_v54 = vsel %vm105_vm1, %v1061_v53, 0.0  ;;  %v1062_v24 = vmul.f32 %v1060_v52, %v1060_v52 }
 0xe1c   :  { %1064 = vadd.xlane.f32.xlu0 %v1063_v54 }
 0xe1d   :  { %v1066_v28 = vsel %vm105_vm1, %v1062_v24, 0.0 }
 0xe20   :  { %1067 = vadd.xlane.f32.xlu0 %v1066_v28 }
 0xea9   :  { %v1065_v55 = vpop.xlane.xlu0 %1064 }
 0xeaa   :  { %v1069_v56 = vmul.f32 0.03125, %v1065_v55 }
 0xeac   :  { %v1071_v17 = vadd.f32 1e-05, %v1069_v56 }
 0xead   :  { %v1068_v57 = vpop.xlane.xlu0 %1067 }
 0xeae   :  { %1462 = vrsqrt.f32 %v1071_v17  ;;  %v1070_v58 = vmul.f32 0.03125, %v1068_v57 }
 0xeb0   :  { %v1072_v59 = vadd.f32 1e-05, %v1070_v58 }
 0xeb2   :  { %1464 = vrsqrt.f32 %v1072_v59 }
 0xeb8   :  { %v1463_v61 = vpop.eup %1462 }
 0xeb9   :  { %v1075_v62 = vmul.f32 %v1463_v61, %v1059_v49 }
 0xebb   :  { %v1081_v6 = vmul.f32 %v1080_v63, %v1075_v62 }
 0xebc   :  { %v1465_v2 = vpop.eup %1464 }
 0xebd   :  { %v1076_v5 = vmul.f32 %v1465_v2, %v1060_v52  ;;  %v1087_v11 = vadd.f32 %v1086_v10, %v1081_v6 }
 0xebf   :  { %v1082_v48 = vmul.f32 %v1080_v63, %v1076_v5 }
 0xec1   :  { %v1088_v51 = vadd.f32 %v1086_v10, %v1082_v48 }
 0xec3   :  { %v1090_v13 = vpack.c.bf16 %v1088_v51, %v1087_v11 }
 0xec5   :  { %1379 = vmatpush3.bf16.msra.mxu1 %v1090_v13 }
 0xec6   :  { %1384 = vmatprep.subr.bf16.mxu1 %v1567_v0 }
 0xec8   :  { %1381 = vmatmul.mubr.msk.bf16.vlgmr.msra.gmra.mrb[28].mxu1 %vm206_vm3, %v1089_v14 }
 0xec9   :  { %1385 = vmatpush3.bf16.msra.mxu1 %v1420_v15  ;;  %1388 = vmatprep.mubr.msk.bf16.mxu1 %vm1568_vm0, %v1567_v0 }
 0xeca   :  { %1386 = vmatprep.subr.bf16.mxu1 %v1567_v0 }
 0xecd   :  { %1387 = vmatpush3.bf16.msra.mxu1 %v1421_v16 }
 0xf9b   :  { %v1128_v9 = vpop.f32.mrb[28].mxu1 }
 0xf9c   :  { %v1134_v18 = vpack.c.bf16 %v1128_v9, %v1128_v9  ;;  %v1382_v19 = vpop.f32.mrb[29].mxu1 }
 0xf9d   :  { %v1131_v20 = vpop.f32.mrb[30].mxu1 }
 0xf9e   :  { %v1383_v21 = vpop.f32.mrb[31].mxu1  ;;  %1389 = vmatmul.mubr.msk.bf16.vlgmr.msra.gmra.mrb[32].mxu1 %vm105_vm1, %v1134_v18 }
0x1071   :  { %v1188_v25 = vpop.f32.mrb[32].mxu1 }
0x1072   :  { %v1189_v26 = vadd.f32 %v1188_v25, %v1138_v23  ;;  %v1390_v27 = vpop.f32.mrb[33].mxu1 }
0x1073   :  { %v1191_v0 = vpop.f32.mrb[34].mxu1 }
0x1074   :  { %1194 = vst [vmem:[#allocation8] sm:$0xff] %v1189_v26  ;;  %v1391_v29 = vpop.f32.mrb[35].mxu1 }
0x1075   :  { %1543 = shalt.err (!%p1540_p0)
}
0x1076   :  { %s1544_s9 = scalar_lea.hbm %s1823_s3, 128 }
0x1077   :  { %p1545_p1 = scmp.ne.s32.totalorder %s1823_s3, %s1544_s9  ;;  %p1548_p2 = scmp.lt.u32.totalorder %s1544_s9, %s1823_s3 }
0x1079   :  { %p1550_p3 = pnand %p1548_p2, %p1545_p1 }
0x107b   :  { %1553 = shalt.err (!%p1550_p3)
}
0x107c   :  { %1204 = dma.vmem_to_hbm [thread:$0]  %s1202_s6, 128, %s1823_s3, [#allocation4]  }
0x107d   :  { %1558 = dma.done.wait [#allocation4], 128  }
0x107e   :  { %1559 = vsyncadd [#allocation4], 4294967168 }
0x107f   :  { %1208 = vsyncpa [#allocation3], 1 }
0x1080   :  { %1209 = vsyncpa [#allocation6], 1 }
0x1081   :  { %1210 = vsyncpa [#allocation4], 1 }

</bundles_post_ra>
